<compile_context>
chip_gen: v5e
topology: v5e:2x2
jax: 0.10.0
libtpu: 0.0.40
codegen_flags: <defaults>
</compile_context>

<pallas_src>
import jax
import jax.numpy as jnp
from jax.experimental import pallas as pl
from jax.experimental.pallas import tpu as pltpu


def _kd_loss_kernel(x_ref, y_ref, pw_ref, o_ref):
    x = x_ref[...].astype(jnp.float32)      # (tile_r, tile_l) logits
    y = y_ref[...].astype(jnp.float32)      # (tile_r, tile_l) targets (old logits)
    pw = pw_ref[...].astype(jnp.float32)    # (tile_r, 1) per-row pos_weight

    # Numerically-stable BCEWithLogits (same formula PyTorch uses):
    #   softplus(-x) = log1p(exp(-|x|)) + max(-x, 0)
    #   loss = (1 - y) * x + (1 + (pw - 1) * y) * softplus(-x)
    softplus_neg_x = jnp.log1p(jnp.exp(-jnp.abs(x))) + jnp.maximum(-x, 0.0)
    log_weight = (pw - 1.0) * y + 1.0
    o_ref[...] = ((1.0 - y) * x + log_weight * softplus_neg_x).astype(o_ref.dtype)


def _choose_tiles(rows, lanes, block_bytes=2 << 20, elem_bytes=4):
    """Pick (tile_r, tile_l): lane tile is full extent or an exact multiple of 128."""
    if lanes * elem_bytes <= block_bytes or lanes % 128 != 0:
        tile_l = lanes                       # full lane extent (always legal)
    else:
        max_l = max(128, (block_bytes // elem_bytes) // 128 * 128)
        tile_l = 128
        cand = max_l
        while cand >= 128:                   # largest multiple-of-128 divisor of lanes
            if lanes % cand == 0:
                tile_l = cand
                break
            cand -= 128
    tile_r = max(8, (block_bytes // (tile_l * elem_bytes)) // 8 * 8)
    if tile_r >= rows:
        tile_r = rows                        # full row extent (always legal)
    return tile_r, tile_l


def kd_loss(logit, logit_old, pos_weight=None):
    """Elementwise BCE-with-logits KD loss, returned in NCHW (reduction='none')."""
    n, c, h, w = logit.shape
    rows, lanes = n * c, h * w

    x2 = logit.reshape(rows, lanes)
    y2 = logit_old.reshape(rows, lanes)
    if pos_weight is None:
        pw_rows = jnp.ones((rows, 1), jnp.float32)
    else:
        pw = jnp.asarray(pos_weight, jnp.float32).reshape(c)
        pw_rows = jnp.tile(pw, (n,)).reshape(rows, 1)

    tile_r, tile_l = _choose_tiles(rows, lanes)
    grid = (pl.cdiv(rows, tile_r), lanes // tile_l)

    out2 = pl.pallas_call(
        _kd_loss_kernel,
        out_shape=jax.ShapeDtypeStruct((rows, lanes), logit.dtype),
        grid=grid,
        in_specs=[
            pl.BlockSpec((tile_r, tile_l), lambda i, j: (i, j)),
            pl.BlockSpec((tile_r, tile_l), lambda i, j: (i, j)),
            pl.BlockSpec((tile_r, 1), lambda i, j: (i, 0)),
        ],
        out_specs=pl.BlockSpec((tile_r, tile_l), lambda i, j: (i, j)),
        compiler_params=pltpu.CompilerParams(
            dimension_semantics=("parallel", "parallel")),
    )(x2, y2, pw_rows)

    return out2.reshape(n, c, h, w)


def _kd_loss_ref(logit, logit_old, pos_weight=None):
    x = logit.astype(jnp.float32)
    y = logit_old.astype(jnp.float32)
    sp = jnp.log1p(jnp.exp(-jnp.abs(x))) + jnp.maximum(-x, 0.0)
    if pos_weight is None:
        lw = 1.0
    else:
        lw = (jnp.asarray(pos_weight, jnp.float32).reshape(1, -1, 1, 1) - 1.0) * y + 1.0
    return ((1.0 - y) * x + lw * sp).astype(logit.dtype)


if __name__ == "__main__":
    key = jax.random.PRNGKey(0)
    k1, k2, k3 = jax.random.split(key, 3)

    N, C, H, W = 2, 4, 16, 16
    logit = jax.random.normal(k1, (N, C, H, W), jnp.float32)
    logit_old = jax.random.normal(k2, (N, C, H, W), jnp.float32)
    pos_weight = jax.random.uniform(k3, (C,), jnp.float32, 0.5, 2.0)

    # Default KDLoss(): pos_weight=None.
    out0 = jax.block_until_ready(kd_loss(logit, logit_old))
    ref0 = _kd_loss_ref(logit, logit_old)
    assert out0.shape == (N, C, H, W)
    assert jnp.allclose(out0, ref0, rtol=1e-5, atol=1e-6), (out0.ravel()[:4], ref0.ravel()[:4])

    # With a per-channel pos_weight.
    out1 = jax.block_until_ready(kd_loss(logit, logit_old, pos_weight))
    ref1 = _kd_loss_ref(logit, logit_old, pos_weight)
    assert jnp.allclose(out1, ref1, rtol=1e-5, atol=1e-6), (out1.ravel()[:4], ref1.ravel()[:4])

    print("KERNEL_OK")
</pallas_src>

<mosaic_0001>
module attributes {stable_mosaic.version = 11 : i64} {
  func.func @_kd_loss_kernel(%arg0: i32, %arg1: i32, %arg2: memref<8x256xf32, #tpu.memory_space<vmem>>, %arg3: memref<8x256xf32, #tpu.memory_space<vmem>>, %arg4: memref<8x1xf32, #tpu.memory_space<vmem>>, %arg5: memref<8x256xf32, #tpu.memory_space<vmem>>) attributes {dimension_semantics = [#tpu.dimension_semantics<parallel>, #tpu.dimension_semantics<parallel>], iteration_bounds = array<i64: 1, 1>, scalar_prefetch = 0 : i64, scratch_operands = 0 : i64, tpu.core_type = #tpu.core_type<tc>, window_params = [{transform_indices = @transform_0, window_bounds = array<i64: 8, 256>}, {transform_indices = @transform_1, window_bounds = array<i64: 8, 256>}, {transform_indices = @transform_2, window_bounds = array<i64: 8, 1>}, {transform_indices = @transform_3, window_bounds = array<i64: 8, 256>}]} {
    %c0 = arith.constant 0 : index
    %c0_0 = arith.constant 0 : index
    %0 = vector.load %arg2[%c0, %c0_0] : memref<8x256xf32, #tpu.memory_space<vmem>>, vector<8x256xf32>
    %c0_1 = arith.constant 0 : index
    %c0_2 = arith.constant 0 : index
    %1 = vector.load %arg3[%c0_1, %c0_2] : memref<8x256xf32, #tpu.memory_space<vmem>>, vector<8x256xf32>
    %c0_3 = arith.constant 0 : index
    %c0_4 = arith.constant 0 : index
    %2 = vector.load %arg4[%c0_3, %c0_4] : memref<8x1xf32, #tpu.memory_space<vmem>>, vector<8x1xf32>
    %3 = math.absf %0 : vector<8x256xf32>
    %cst = arith.constant 0.000000e+00 : f32
    %4 = vector.broadcast %cst : f32 to vector<8x256xf32>
    %5 = arith.subf %4, %3 : vector<8x256xf32>
    %6 = math.exp %5 : vector<8x256xf32>
    %7 = math.log1p %6 : vector<8x256xf32>
    %cst_5 = arith.constant 0.000000e+00 : f32
    %8 = vector.broadcast %cst_5 : f32 to vector<8x256xf32>
    %9 = arith.subf %8, %0 : vector<8x256xf32>
    %cst_6 = arith.constant 0.000000e+00 : f32
    %10 = vector.broadcast %cst_6 : f32 to vector<8x256xf32>
    %11 = arith.maximumf %9, %10 : vector<8x256xf32>
    %12 = arith.addf %7, %11 : vector<8x256xf32>
    %cst_7 = arith.constant 1.000000e+00 : f32
    %13 = vector.broadcast %cst_7 : f32 to vector<8x1xf32>
    %14 = arith.subf %2, %13 : vector<8x1xf32>
    %15 = vector.broadcast %14 : vector<8x1xf32> to vector<8x256xf32>
    %16 = arith.mulf %15, %1 : vector<8x256xf32>
    %cst_8 = arith.constant 1.000000e+00 : f32
    %17 = vector.broadcast %cst_8 : f32 to vector<8x256xf32>
    %18 = arith.addf %16, %17 : vector<8x256xf32>
    %cst_9 = arith.constant 1.000000e+00 : f32
    %19 = vector.broadcast %cst_9 : f32 to vector<8x256xf32>
    %20 = arith.subf %19, %1 : vector<8x256xf32>
    %21 = arith.mulf %20, %0 : vector<8x256xf32>
    %22 = arith.mulf %18, %12 : vector<8x256xf32>
    %23 = arith.addf %21, %22 : vector<8x256xf32>
    %c0_10 = arith.constant 0 : index
    %c0_11 = arith.constant 0 : index
    %24 = vector.load %arg5[%c0_10, %c0_11] : memref<8x256xf32, #tpu.memory_space<vmem>>, vector<8x256xf32>
    tpu.vector_store %arg5[%c0_10, %c0_11], %23 {strides = array<i32>} : memref<8x256xf32, #tpu.memory_space<vmem>>, vector<8x256xf32>,
    return
  }
  func.func @transform_0(%arg0: i32, %arg1: i32) -> (i32, i32) {
    %c0_i32 = arith.constant 0 : i32
    return %arg0, %arg1 : i32, i32
  }
  func.func @transform_1(%arg0: i32, %arg1: i32) -> (i32, i32) {
    %c0_i32 = arith.constant 0 : i32
    return %arg0, %arg1 : i32, i32
  }
  func.func @transform_2(%arg0: i32, %arg1: i32) -> (i32, i32) {
    %c0_i32 = arith.constant 0 : i32
    %c0_i32_0 = arith.constant 0 : i32
    return %arg0, %c0_i32 : i32, i32
  }
  func.func @transform_3(%arg0: i32, %arg1: i32) -> (i32, i32) {
    %c0_i32 = arith.constant 0 : i32
    return %arg0, %arg1 : i32, i32
  }
}

</mosaic_0001>

<bundles_post_ra>
// kernel: tpu_custom_call.1
= control target key start
LH: loop header
LB: loop body
LE: loop exit
PB: predicated region body
PF: predicated region fallthrough
CT: control target
= control target key end

     0   :  { %8 = vsyncpa [#allocation3], 0  ;;  %s246_s0 = inlined_call_operand.hbm [shape: f32[8,256], index: 0, kind: input, shape index: {}]   ;;  %s247_s1 = inlined_call_operand.hbm [shape: f32[8,256], index: 1, kind: input, shape index: {}]   ;;  %s248_s2 = inlined_call_operand.vmem [shape: f32[8,1], index: 2, kind: input, shape index: {}]   ;;  %s249_s3 = inlined_call_operand.hbm [shape: f32[8,256], index: 3, kind: output, shape index: {}]  }
   0x1   :  { %9 = vsyncpa [#allocation6], 0 }
   0x2   :  { %10 = vsyncpa [#allocation4], 0  ;;  %s16_s14 = sshll.u32 %s246_s0, 4  ;;  %s210_s15 = smov [#allocation2]   ;;  %s17_s14 = int_to_ptr.hbm [resolvable:$true] %s16_s14 }
   0x3   :  { %s18_s16 = sshll.u32 %s210_s15, 4  ;;  %s27_s19 = sshll.u32 %s247_s1, 4  ;;  %s19_s16 = int_to_ptr.vmem [resolvable:$true] %s18_s16  ;;  %s28_s19 = int_to_ptr.hbm [resolvable:$true] %s27_s19 }
   0x4   :  { %21 = dma.hbm_to_vmem [thread:$0]  %s17_s14, 256, %s19_s16, [#allocation3]  }
   0x5   :  { %s211_s20 = smov [#allocation5]  }
   0x6   :  { %s29_s21 = sshll.u32 %s211_s20, 4  ;;  %s30_s21 = int_to_ptr.vmem [resolvable:$true] %s29_s21 }
   0x7   :  { %32 = dma.hbm_to_vmem [thread:$0]  %s28_s19, 256, %s30_s21, [#allocation6]  }
   0x8   :  { %204 = dma.done.wait [#allocation3], 256  }
   0x9   :  { %205 = vsyncadd [#allocation3], 4294967040 }
   0xa   :  { %206 = dma.done.wait [#allocation6], 256  }
   0xb   :  { %207 = vsyncadd [#allocation6], 4294967040  ;;  %v212_v0 = vmov 0   ;;  %v47_v1 = vld [vmem:[%s248_s2] sm:$0xff]  ;;  %v44_v4 = vld [vmem:[#allocation2 + $0x8] sm:$0xff]  ;;  %s213_s1 = smov [#allocation7]  }
   0xc   :  { %123 = vset.pattern.permute.xlu0 %v212_v0  ;;  %v118_v2 = vadd.f32 -1.0, %v47_v1  ;;  %v43_v3 = vld [vmem:[#allocation2] sm:$0xff]  ;;  %v49_v6 = vand.u32 2147483647, %v44_v4  ;;  %v75_v24 = vsub.f32 0.0, %v44_v4  ;;  %v45_v31 = vld [vmem:[#allocation5] sm:$0xff] }
   0xd   :  { %v48_v5 = vand.u32 2147483647, %v43_v3  ;;  %v74_v23 = vsub.f32 0.0, %v43_v3  ;;  %v46_v32 = vld [vmem:[#allocation5 + $0x8] sm:$0xff]  ;;  %v90_v35 = vsub.f32 1.0, %v45_v31  ;;  %s105_s2 = sshll.u32 %s213_s1, 4  ;;  %s106_s2 = int_to_ptr.vmem [resolvable:$true] %s105_s2 }
   0xe   :  { %83 = vperm.xlu0 %123, %v118_v2   ;;  %v51_v8 = vsub.f32 0.0, %v49_v6  ;;  %v77_v30 = vmax.f32 %v75_v24, 0.0  ;;  %v91_v36 = vsub.f32 1.0, %v46_v32  ;;  %s107_s25 = sshll.u32 %s249_s3, 4  ;;  %s108_s25 = int_to_ptr.hbm [resolvable:$true] %s107_s25 }
   0xf   :  { %v50_v7 = vsub.f32 0.0, %v48_v5  ;;  %v76_v29 = vmax.f32 %v74_v23, 0.0  ;;  %v92_v44 = vmul.f32 %v90_v35, %v43_v3 }
  0x10   :  { %v54_v10 = vmul.f32 1.442695, %v51_v8  ;;  %v93_v45 = vmul.f32 %v91_v36, %v44_v4 }
  0x11   :  { %v52_v9 = vmul.f32 1.442695, %v50_v7 }
  0x13   :  { %124 = vpow2.f32 %v52_v9 }
  0x14   :  { %126 = vpow2.f32 %v54_v10 }
  0x19   :  { %v125_v11 = vpop.eup %124 }
  0x1a   :  { %v127_v12 = vpop.eup %126  ;;  %v56_v13 = vadd.f32 1.0, %v125_v11  ;;  %v59_v15 = vmul.f32 -0.5, %v125_v11  ;;  %v62_v21 = vand.u32 2147483647, %v125_v11 }
  0x1b   :  { %v65_v14 = vadd.f32 1.0, %v127_v12  ;;  %v68_v16 = vmul.f32 -0.5, %v127_v12  ;;  %v71_v22 = vand.u32 2147483647, %v127_v12 }
  0x1c   :  { %128 = vlog2.f32 %v56_v13  ;;  %v60_v18 = vadd.f32 1.0, %v59_v15  ;;  %vm63_vm0 = vcmp.lt.f32.partialorder %v62_v21, 0.0004427343 }
  0x1d   :  { %130 = vlog2.f32 %v65_v14  ;;  %v69_v19 = vadd.f32 1.0, %v68_v16  ;;  %vm72_vm1 = vcmp.lt.f32.partialorder %v71_v22, 0.0004427343 }
  0x1e   :  { %v61_v26 = vmul.f32 %v125_v11, %v60_v18 }
  0x1f   :  { %v70_v28 = vmul.f32 %v127_v12, %v69_v19 }
  0x22   :  { %v129_v17 = vpop.eup %128 }
  0x23   :  { %v131_v20 = vpop.eup %130  ;;  %v58_v25 = vmul.f32 0.6931472, %v129_v17 }
  0x24   :  { %v67_v27 = vmul.f32 0.6931472, %v131_v20 }
  0x25   :  { %v64_v33 = vsel %vm63_vm0, %v61_v26, %v58_v25 }
  0x26   :  { %v73_v34 = vsel %vm72_vm1, %v70_v28, %v67_v27  ;;  %v78_v38 = vadd.f32 %v76_v29, %v64_v33 }
  0x27   :  { %v79_v39 = vadd.f32 %v77_v30, %v73_v34 }
  0x80   :  { %v84_v37 = vpop.permute.xlu0 %83 }
  0x81   :  { %v86_v40 = vmul.f32 %v84_v37, %v45_v31  ;;  %v87_v41 = vmul.f32 %v84_v37, %v46_v32 }
  0x83   :  { %v88_v42 = vadd.f32 1.0, %v86_v40  ;;  %v89_v43 = vadd.f32 1.0, %v87_v41 }
  0x85   :  { %v94_v46 = vmul.f32 %v88_v42, %v78_v38  ;;  %v95_v47 = vmul.f32 %v89_v43, %v79_v39 }
  0x87   :  { %v96_v48 = vadd.f32 %v94_v46, %v92_v44  ;;  %v97_v49 = vadd.f32 %v95_v47, %v93_v45 }
  0x89   :  { %98 = vst [vmem:[#allocation7] sm:$0xff] %v96_v48 }
  0x8a   :  { %99 = vst [vmem:[#allocation7 + $0x8] sm:$0xff] %v97_v49 }
  0x8b   :  { %110 = dma.vmem_to_hbm [thread:$0]  %s106_s2, 256, %s108_s25, [#allocation4]  }
  0x8c   :  { %208 = dma.done.wait [#allocation4], 256  }
  0x8d   :  { %209 = vsyncadd [#allocation4], 4294967040 }
  0x8e   :  { %115 = vsyncpa [#allocation3], 1 }
  0x8f   :  { %116 = vsyncpa [#allocation6], 1 }
  0x90   :  { %117 = vsyncpa [#allocation4], 1 }

</bundles_post_ra>
